<compile_context>
chip_gen: v7x
topology: tpu7x:2x2x1
jax: 0.10.0
libtpu: 0.0.40
codegen_flags: <defaults>
</compile_context>

<pallas_src>
import functools

import jax
import jax.numpy as jnp
import numpy as np
from jax import lax
from jax.experimental import pallas as pl
from jax.experimental.pallas import tpu as pltpu

_EPS = 1e-5
_HIGH = lax.Precision.HIGHEST
_NEG = -1e30  # stands in for -inf in maxpool padding (keeps infs off the MXU)


def _default_tile_cols():
    """Generation-aware column tile: larger on 128-MiB-VMEM parts (v5e/v6e),
    conservative on v7x (64 MiB per TensorCore)."""
    try:
        vmem = pltpu.get_tpu_info().vmem_capacity_bytes
        return 2048 if vmem > (64 << 20) else 1024
    except Exception:
        return 1024


# --------------------------------------------------------------------------- #
# Kernel 1: bottleneck + im2col inception convs + maxpool branch fused into a
# single (4*C_out, K_total) x (K_total, TN) matmul per column tile, plus
# per-tile (lane-dense) BatchNorm partial statistics.
# --------------------------------------------------------------------------- #
def _y_stats_kernel(meta_ref, xa_ref, xb_ref, wbot_ref, bbot_ref,
                    wbig_ref, bbig_ref, y_ref, stats_ref, z_ref,
                    *, L, TN, PAD, p0, cdt, prec):
    meta = meta_ref[...]
    t = meta[0:1, :]                                        # (1, TN) int32
    vf = (meta[1:2, :] > 0).astype(jnp.float32)             # (1, TN) validity

    # Halo'd window of x: [main TN block | 2*PAD halo block] -> (C_in, TN+2PAD)
    xw = jnp.concatenate([xa_ref[...], xb_ref[...]], axis=1)

    # Bottleneck (1x1 conv) on the halo'd window: bf16 MXU operands, f32 acc.
    xbot = jnp.dot(wbot_ref[...], xw.astype(cdt), precision=prec,
                   preferred_element_type=jnp.float32) + bbot_ref[...]
    xbot = xbot.astype(cdt)                                  # (C_out, TN+2PAD)

    C_out = xbot.shape[0]
    k0 = 2 * p0 + 1

    # im2col: shifted copies of the bottleneck output (shared by all three
    # conv branches); zero across sequence boundaries == SAME padding.
    zero = jnp.zeros((), cdt)
    for d in range(-p0, p0 + 1):
        ok = jnp.logical_and(t + d >= 0, t + d < L)          # (1, TN)
        tap = jnp.where(ok, xbot[:, PAD + d:PAD + d + TN], zero)
        r0 = (d + p0) * C_out
        z_ref[r0:r0 + C_out, :] = tap

    # MaxPool1d(3, stride=1, pad=1) on original x, per-sequence -inf padding
    # (kept in f32 on the VPU).
    center = xw[:, PAD:PAD + TN]
    left = jnp.where(t >= 1, xw[:, PAD - 1:PAD - 1 + TN], _NEG)
    right = jnp.where(t <= L - 2, xw[:, PAD + 1:PAD + 1 + TN], _NEG)
    pooled = jnp.maximum(jnp.maximum(left, center), right)   # (C_in, TN)
    z_ref[k0 * C_out:, :] = pooled.astype(cdt)

    # One fused matmul -> all four concatenated branches (pre-bias, f32 acc).
    acc = jnp.dot(wbig_ref[...], z_ref[...], precision=prec,
                  preferred_element_type=jnp.float32)        # (4C, TN)
    y_ref[...] = (acc + bbig_ref[...]).astype(y_ref.dtype)
    # TODO(synk): if the y write-back shows up as exposed DMA after the bf16
    # change, add pipeline_mode=pl.Buffered(3) on the y out_spec.

    # Per-tile BN partials on the pre-bias activations (f32, lane-dense out).
    am = acc * vf
    s = jnp.sum(am, axis=1, keepdims=True)                   # (4C, 1)
    q = jnp.sum(am * am, axis=1, keepdims=True)              # (4C, 1)
    stats_ref[...] = jnp.concatenate([s, q], axis=1).T[None]  # (1, 2, 4C)
    # TODO(synk): BatchNorm running-stat (momentum) buffer updates are a
    # training-only side effect with no influence on the forward output.


# --------------------------------------------------------------------------- #
# Kernel 2: hoisted BN affine (scale, shift) + ReLU, tiled over columns.
# --------------------------------------------------------------------------- #
def _bn_relu_kernel(y_ref, scale_ref, shift_ref, out_ref):
    y = y_ref[...].astype(jnp.float32)
    out_ref[...] = jnp.maximum(y * scale_ref[...] + shift_ref[...], 0.0)


# --------------------------------------------------------------------------- #
# Wrapper: layout plumbing, host-side weight fusion, two pallas_calls.
# --------------------------------------------------------------------------- #
def inception_module_pallas(x, params, kernel_sizes, *, use_bf16=True,
                            tile_cols=None):
    (wb, bb, w0, b0, w1, b1, w2, b2, wmp, bmp, gamma, beta) = params
    B, C_in, L = x.shape
    C_out = wb.shape[0]
    C4 = 4 * C_out
    ks = list(kernel_sizes)
    ps = [(k - 1) // 2 for k in ks]
    k0, p0 = ks[0], ps[0]
    f32 = jnp.float32
    cdt = jnp.bfloat16 if use_bf16 else f32
    prec = None if use_bf16 else _HIGH

    n = B * L
    PAD = 64 * ((max(p0, 1) + 63) // 64)         # halo per side; 2*PAD % 128 == 0
    HB = 2 * PAD                                 # halo block width (mult. of 128)

    if tile_cols is None:
        tile_cols = _default_tile_cols()
    TN = min(tile_cols, HB * pl.cdiv(n, HB))
    TN = max(HB, (TN // HB) * HB)                # TN is a multiple of HB
    if n > HB and pl.cdiv(n, TN) == 1:           # prefer >=2 tiles (v7x megacore)
        TN = max(HB, HB * pl.cdiv(pl.cdiv(n, 2), HB))
    T = pl.cdiv(n, TN)
    Lp = T * TN
    NB = TN // HB

    # Fold batch into the lane axis: column g = b*L + t, zero-pad left/right.
    # TODO(synk): for long sequences (L % 128 == 0) a (B, L-tile) grid writing
    # (B, 4C, L) directly would remove this transpose/pad and the output
    # transpose below.
    x_cols = jnp.transpose(x, (1, 0, 2)).reshape(C_in, n).astype(f32)
    x_pad = jnp.pad(x_cols, ((0, 0), (PAD, PAD + Lp - n)))   # (C_in, Lp + 2*PAD)

    cols = jnp.arange(Lp, dtype=jnp.int32)
    meta = jnp.stack([cols % L, (cols < n).astype(jnp.int32)], axis=0)  # (2, Lp)

    # Fuse the three branch conv weights + the maxpool 1x1 weight host-side.
    K_total = k0 * C_out + C_in
    w_big = jnp.zeros((C4, K_total), f32)
    for i, (w, k, p) in enumerate(zip((w0, w1, w2), ks, ps)):
        for tap in range(k):
            c0 = (tap - p + p0) * C_out
            w_big = w_big.at[i * C_out:(i + 1) * C_out,
                             c0:c0 + C_out].set(w[:, :, tap])
    w_big = w_big.at[3 * C_out:, k0 * C_out:].set(wmp[:, :, 0])
    b_big = jnp.concatenate([b0, b1, b2, bmp]).astype(f32)               # (4C,)

    wbot_c = wb[:, :, 0].astype(cdt)
    wbig_c = w_big.astype(cdt)

    full = lambda *s: pl.BlockSpec(s, lambda j: (0,) * len(s))
    cparams = pltpu.CompilerParams(
        dimension_semantics=("parallel",),        # shard tiles across 2 TCs on v7x
        vmem_limit_bytes=48 * 1024 * 1024)        # safe under v7x 64 MiB per-TC

    kern = functools.partial(_y_stats_kernel, L=L, TN=TN, PAD=PAD, p0=p0,
                             cdt=cdt, prec=prec)
    y_pre, stats = pl.pallas_call(
        kern,
        grid=(T,),
        in_specs=[
            pl.BlockSpec((2, TN), lambda j: (0, j)),                 # meta
            pl.BlockSpec((C_in, TN), lambda j: (0, j)),              # x main block
            pl.BlockSpec((C_in, HB), lambda j: (0, (j + 1) * NB)),   # x halo block
            full(C_out, C_in), full(C_out, 1),                       # bottleneck
            full(C4, K_total), full(C4, 1),                          # fused weights
        ],
        out_specs=[
            pl.BlockSpec((C4, TN), lambda j: (0, j)),                # pre-BN y
            pl.BlockSpec((1, 2, C4), lambda j: (j, 0, 0)),           # BN partials
        ],
        out_shape=[
            jax.ShapeDtypeStruct((C4, Lp), cdt),
            jax.ShapeDtypeStruct((T, 2, C4), f32),
        ],
        scratch_shapes=[pltpu.VMEM((K_total, TN), cdt)],             # im2col z
        compiler_params=cparams,
    )(meta, x_pad, x_pad, wbot_c, bb.astype(f32)[:, None], wbig_c,
      b_big[:, None])

    # BatchNorm1d (training-mode batch stats, biased variance) from partials,
    # with the affine hoisted into a single scale/shift per channel.  Stats
    # were accumulated on pre-bias activations (variance is shift-invariant).
    ssum = jnp.sum(stats, axis=0)                       # (2, 4C)
    mean_acc = ssum[0] / n
    var = jnp.maximum(ssum[1] / n - mean_acc * mean_acc, 0.0)
    # TODO(synk): for very large B*L consider a Welford-style partial merge.
    scale = gamma * lax.rsqrt(var + _EPS)
    shift = beta - (mean_acc + b_big) * scale

    out_cols = pl.pallas_call(
        _bn_relu_kernel,
        grid=(T,),
        in_specs=[
            pl.BlockSpec((C4, TN), lambda j: (0, j)),
            full(C4, 1), full(C4, 1),
        ],
        out_specs=pl.BlockSpec((C4, TN), lambda j: (0, j)),
        out_shape=jax.ShapeDtypeStruct((C4, Lp), f32),
        compiler_params=cparams,
    )(y_pre, scale.astype(f32)[:, None], shift.astype(f32)[:, None])

    # Back to PyTorch layout (B, 4*C_out, L).
    return jnp.transpose(out_cols[:, :n].reshape(C4, B, L), (1, 0, 2))


# --------------------------------------------------------------------------- #
# Deterministic parameter init (matches the torch module's shapes)
# --------------------------------------------------------------------------- #
def init_params(key, c_in, c_out, kernel_size):
    ks = [kernel_size // (2 ** i) for i in range(3)]
    ks = [k if k % 2 != 0 else k - 1 for k in ks]
    keys = jax.random.split(key, 12)

    def w(k, shape, scale=0.1):
        return scale * jax.random.normal(k, shape, jnp.float32)

    wb = w(keys[0], (c_out, c_in, 1));      bb = w(keys[1], (c_out,))
    w0 = w(keys[2], (c_out, c_out, ks[0])); b0 = w(keys[3], (c_out,))
    w1 = w(keys[4], (c_out, c_out, ks[1])); b1 = w(keys[5], (c_out,))
    w2 = w(keys[6], (c_out, c_out, ks[2])); b2 = w(keys[7], (c_out,))
    wmp = w(keys[8], (c_out, c_in, 1));     bmp = w(keys[9], (c_out,))
    gamma = 1.0 + w(keys[10], (4 * c_out,))
    beta = w(keys[11], (4 * c_out,))
    return (wb, bb, w0, b0, w1, b1, w2, b2, wmp, bmp, gamma, beta), ks


# --------------------------------------------------------------------------- #
# Pure-JAX reference (matches the PyTorch forward semantics)
# --------------------------------------------------------------------------- #
def _ref_conv_same(x, w, b):
    k = w.shape[-1]
    p = (k - 1) // 2
    y = lax.conv_general_dilated(
        x, w, window_strides=(1,), padding=[(p, p)],
        dimension_numbers=("NCH", "OIH", "NCH"), precision=_HIGH)
    return y + b[None, :, None]


def reference(x, params):
    (wb, bb, w0, b0, w1, b1, w2, b2, wmp, bmp, gamma, beta) = params
    x_bot = _ref_conv_same(x, wb, bb)
    outs = [_ref_conv_same(x_bot, w0, b0),
            _ref_conv_same(x_bot, w1, b1),
            _ref_conv_same(x_bot, w2, b2)]
    pooled = lax.reduce_window(
        x, -jnp.inf, lax.max, (1, 1, 3), (1, 1, 1),
        [(0, 0), (0, 0), (1, 1)])
    outs.append(_ref_conv_same(pooled, wmp, bmp))
    y = jnp.concatenate(outs, axis=1)
    mean = jnp.mean(y, axis=(0, 2), keepdims=True)
    var = jnp.mean((y - mean) ** 2, axis=(0, 2), keepdims=True)
    yn = (y - mean) / jnp.sqrt(var + _EPS)
    yn = yn * gamma[None, :, None] + beta[None, :, None]
    return jnp.maximum(yn, 0.0)


# --------------------------------------------------------------------------- #
if __name__ == "__main__":
    key = jax.random.PRNGKey(0)
    B, C_in, C_out, L, KS = 2, 4, 8, 16, 8   # KS=8 -> kernel sizes [7, 3, 1]
    k_x, k_p = jax.random.split(key)
    x = jax.random.normal(k_x, (B, C_in, L), jnp.float32)
    params, ks = init_params(k_p, C_in, C_out, KS)

    ref = reference(x, params)

    # Default (performant) path: bf16 MXU operands + bf16 intermediate.
    # After BN normalization (unit-variance outputs) bf16 rounding shows up as
    # an O(1e-2) absolute error, hence the looser tolerance here.
    out = jax.block_until_ready(inception_module_pallas(x, params, ks))
    np.testing.assert_allclose(np.asarray(out), np.asarray(ref),
                               rtol=4e-2, atol=4e-2)

    # Exactness path: f32 operands + Precision.HIGHEST, f32 intermediate.
    out_f32 = jax.block_until_ready(
        inception_module_pallas(x, params, ks, use_bf16=False))
    np.testing.assert_allclose(np.asarray(out_f32), np.asarray(ref),
                               rtol=1e-4, atol=1e-4)

    print("KERNEL_OK")
</pallas_src>

<mosaic_0001>
module attributes {stable_mosaic.version = 11 : i64} {
  func.func @_y_stats_kernel(%arg0: i32, %arg1: memref<2x128xi32, #tpu.memory_space<vmem>>, %arg2: memref<4x128xf32, #tpu.memory_space<vmem>>, %arg3: memref<4x128xf32, #tpu.memory_space<vmem>>, %arg4: memref<8x4xbf16, #tpu.memory_space<vmem>>, %arg5: memref<8x1xf32, #tpu.memory_space<vmem>>, %arg6: memref<32x60xbf16, #tpu.memory_space<vmem>>, %arg7: memref<32x1xf32, #tpu.memory_space<vmem>>, %arg8: memref<32x128xbf16, #tpu.memory_space<vmem>>, %arg9: memref<1x2x32xf32, #tpu.memory_space<vmem>>, %arg10: memref<60x128xbf16, #tpu.memory_space<vmem>>) attributes {dimension_semantics = [#tpu.dimension_semantics<parallel>], iteration_bounds = array<i64: 1>, scalar_prefetch = 0 : i64, scratch_operands = 1 : i64, tpu.core_type = #tpu.core_type<tc>, window_params = [{transform_indices = @transform_0, window_bounds = array<i64: 2, 128>}, {transform_indices = @transform_1, window_bounds = array<i64: 4, 128>}, {transform_indices = @transform_2, window_bounds = array<i64: 4, 128>}, {pipeline_mode = #tpu.pipeline_mode<synchronous>, transform_indices = @transform_3, window_bounds = array<i64: 8, 4>}, {pipeline_mode = #tpu.pipeline_mode<synchronous>, transform_indices = @transform_4, window_bounds = array<i64: 8, 1>}, {pipeline_mode = #tpu.pipeline_mode<synchronous>, transform_indices = @transform_5, window_bounds = array<i64: 32, 60>}, {pipeline_mode = #tpu.pipeline_mode<synchronous>, transform_indices = @transform_6, window_bounds = array<i64: 32, 1>}, {transform_indices = @transform_7, window_bounds = array<i64: 32, 128>}, {transform_indices = @transform_8, window_bounds = array<i64: 1, 2, 32>}]} {
    %c0 = arith.constant 0 : index
    %c0_0 = arith.constant 0 : index
    %0 = vector.load %arg1[%c0, %c0_0] : memref<2x128xi32, #tpu.memory_space<vmem>>, vector<2x128xi32>
    %1 = vector.extract_strided_slice %0 {offsets = [0, 0], sizes = [1, 128], strides = [1, 1]} : vector<2x128xi32> to vector<1x128xi32>
    %2 = vector.extract_strided_slice %0 {offsets = [1, 0], sizes = [1, 128], strides = [1, 1]} : vector<2x128xi32> to vector<1x128xi32>
    %c0_i32 = arith.constant 0 : i32
    %3 = vector.broadcast %c0_i32 : i32 to vector<1x128xi32>
    %4 = arith.cmpi sgt, %2, %3 : vector<1x128xi32>
    %5 = arith.extui %4 : vector<1x128xi1> to vector<1x128xi32>
    %6 = arith.sitofp %5 : vector<1x128xi32> to vector<1x128xf32>
    %c0_1 = arith.constant 0 : index
    %c0_2 = arith.constant 0 : index
    %7 = vector.load %arg2[%c0_1, %c0_2] : memref<4x128xf32, #tpu.memory_space<vmem>>, vector<4x128xf32>
    %c0_3 = arith.constant 0 : index
    %c0_4 = arith.constant 0 : index
    %8 = vector.load %arg3[%c0_3, %c0_4] : memref<4x128xf32, #tpu.memory_space<vmem>>, vector<4x128xf32>
    %9 = tpu.concatenate %7, %8 in 1 : vector<4x128xf32>, vector<4x128xf32> -> vector<4x256xf32>
    %c0_5 = arith.constant 0 : index
    %c0_6 = arith.constant 0 : index
    %10 = vector.load %arg4[%c0_5, %c0_6] : memref<8x4xbf16, #tpu.memory_space<vmem>>, vector<8x4xbf16>
    %11 = arith.truncf %9 : vector<4x256xf32> to vector<4x256xbf16>
    %cst = arith.constant dense<0.000000e+00> : vector<8x256xf32>
    %12 = tpu.matmul %10, %11, %cst {dimension_numbers = #tpu.dot_dimension_numbers<[1], [0], [0], [1], [0, 0, 1, 1], [], []>} : vector<8x4xbf16>, vector<4x256xbf16>, vector<8x256xf32> -> vector<8x256xf32>
    %c0_7 = arith.constant 0 : index
    %c0_8 = arith.constant 0 : index
    %13 = vector.load %arg5[%c0_7, %c0_8] : memref<8x1xf32, #tpu.memory_space<vmem>>, vector<8x1xf32>
    %14 = vector.broadcast %13 : vector<8x1xf32> to vector<8x256xf32>
    %15 = arith.addf %12, %14 : vector<8x256xf32>
    %16 = arith.truncf %15 : vector<8x256xf32> to vector<8x256xbf16>
    %c-3_i32 = arith.constant -3 : i32
    %17 = vector.broadcast %c-3_i32 : i32 to vector<1x128xi32>
    %18 = arith.addi %1, %17 : vector<1x128xi32>
    %c0_i32_9 = arith.constant 0 : i32
    %19 = vector.broadcast %c0_i32_9 : i32 to vector<1x128xi32>
    %20 = arith.cmpi sge, %18, %19 : vector<1x128xi32>
    %c-3_i32_10 = arith.constant -3 : i32
    %21 = vector.broadcast %c-3_i32_10 : i32 to vector<1x128xi32>
    %22 = arith.addi %1, %21 : vector<1x128xi32>
    %c16_i32 = arith.constant 16 : i32
    %23 = vector.broadcast %c16_i32 : i32 to vector<1x128xi32>
    %24 = arith.cmpi slt, %22, %23 : vector<1x128xi32>
    %25 = arith.andi %20, %24 : vector<1x128xi1>
    %26 = vector.extract_strided_slice %16 {offsets = [0, 61], sizes = [8, 128], strides = [1, 1]} : vector<8x256xbf16> to vector<8x128xbf16>
    %cst_11 = arith.constant 0.000000e+00 : bf16
    %27 = vector.shape_cast %25 : vector<1x128xi1> to vector<1x128xi1>
    %28 = vector.broadcast %27 : vector<1x128xi1> to vector<8x128xi1>
    %29 = vector.broadcast %cst_11 : bf16 to vector<8x128xbf16>
    %30 = arith.select %28, %26, %29 : vector<8x128xi1>, vector<8x128xbf16>
    %c0_12 = arith.constant 0 : index
    %c0_13 = arith.constant 0 : index
    %31 = vector.load %arg10[%c0_12, %c0_13] : memref<60x128xbf16, #tpu.memory_space<vmem>>, vector<8x128xbf16>
    tpu.vector_store %arg10[%c0_12, %c0_13], %30 {strides = array<i32>} : memref<60x128xbf16, #tpu.memory_space<vmem>>, vector<8x128xbf16>,
    %c-2_i32 = arith.constant -2 : i32
    %32 = vector.broadcast %c-2_i32 : i32 to vector<1x128xi32>
    %33 = arith.addi %1, %32 : vector<1x128xi32>
    %c0_i32_14 = arith.constant 0 : i32
    %34 = vector.broadcast %c0_i32_14 : i32 to vector<1x128xi32>
    %35 = arith.cmpi sge, %33, %34 : vector<1x128xi32>
    %c-2_i32_15 = arith.constant -2 : i32
    %36 = vector.broadcast %c-2_i32_15 : i32 to vector<1x128xi32>
    %37 = arith.addi %1, %36 : vector<1x128xi32>
    %c16_i32_16 = arith.constant 16 : i32
    %38 = vector.broadcast %c16_i32_16 : i32 to vector<1x128xi32>
    %39 = arith.cmpi slt, %37, %38 : vector<1x128xi32>
    %40 = arith.andi %35, %39 : vector<1x128xi1>
    %41 = vector.extract_strided_slice %16 {offsets = [0, 62], sizes = [8, 128], strides = [1, 1]} : vector<8x256xbf16> to vector<8x128xbf16>
    %cst_17 = arith.constant 0.000000e+00 : bf16
    %42 = vector.shape_cast %40 : vector<1x128xi1> to vector<1x128xi1>
    %43 = vector.broadcast %42 : vector<1x128xi1> to vector<8x128xi1>
    %44 = vector.broadcast %cst_17 : bf16 to vector<8x128xbf16>
    %45 = arith.select %43, %41, %44 : vector<8x128xi1>, vector<8x128xbf16>
    %c8 = arith.constant 8 : index
    %c0_18 = arith.constant 0 : index
    %46 = vector.load %arg10[%c8, %c0_18] : memref<60x128xbf16, #tpu.memory_space<vmem>>, vector<8x128xbf16>
    tpu.vector_store %arg10[%c8, %c0_18], %45 {strides = array<i32>} : memref<60x128xbf16, #tpu.memory_space<vmem>>, vector<8x128xbf16>,
    %c-1_i32 = arith.constant -1 : i32
    %47 = vector.broadcast %c-1_i32 : i32 to vector<1x128xi32>
    %48 = arith.addi %1, %47 : vector<1x128xi32>
    %c0_i32_19 = arith.constant 0 : i32
    %49 = vector.broadcast %c0_i32_19 : i32 to vector<1x128xi32>
    %50 = arith.cmpi sge, %48, %49 : vector<1x128xi32>
    %c-1_i32_20 = arith.constant -1 : i32
    %51 = vector.broadcast %c-1_i32_20 : i32 to vector<1x128xi32>
    %52 = arith.addi %1, %51 : vector<1x128xi32>
    %c16_i32_21 = arith.constant 16 : i32
    %53 = vector.broadcast %c16_i32_21 : i32 to vector<1x128xi32>
    %54 = arith.cmpi slt, %52, %53 : vector<1x128xi32>
    %55 = arith.andi %50, %54 : vector<1x128xi1>
    %56 = vector.extract_strided_slice %16 {offsets = [0, 63], sizes = [8, 128], strides = [1, 1]} : vector<8x256xbf16> to vector<8x128xbf16>
    %cst_22 = arith.constant 0.000000e+00 : bf16
    %57 = vector.shape_cast %55 : vector<1x128xi1> to vector<1x128xi1>
    %58 = vector.broadcast %57 : vector<1x128xi1> to vector<8x128xi1>
    %59 = vector.broadcast %cst_22 : bf16 to vector<8x128xbf16>
    %60 = arith.select %58, %56, %59 : vector<8x128xi1>, vector<8x128xbf16>
    %c16 = arith.constant 16 : index
    %c0_23 = arith.constant 0 : index
    %61 = vector.load %arg10[%c16, %c0_23] : memref<60x128xbf16, #tpu.memory_space<vmem>>, vector<8x128xbf16>
    tpu.vector_store %arg10[%c16, %c0_23], %60 {strides = array<i32>} : memref<60x128xbf16, #tpu.memory_space<vmem>>, vector<8x128xbf16>,
    %c0_i32_24 = arith.constant 0 : i32
    %62 = vector.broadcast %c0_i32_24 : i32 to vector<1x128xi32>
    %63 = arith.addi %1, %62 : vector<1x128xi32>
    %c0_i32_25 = arith.constant 0 : i32
    %64 = vector.broadcast %c0_i32_25 : i32 to vector<1x128xi32>
    %65 = arith.cmpi sge, %63, %64 : vector<1x128xi32>
    %c0_i32_26 = arith.constant 0 : i32
    %66 = vector.broadcast %c0_i32_26 : i32 to vector<1x128xi32>
    %67 = arith.addi %1, %66 : vector<1x128xi32>
    %c16_i32_27 = arith.constant 16 : i32
    %68 = vector.broadcast %c16_i32_27 : i32 to vector<1x128xi32>
    %69 = arith.cmpi slt, %67, %68 : vector<1x128xi32>
    %70 = arith.andi %65, %69 : vector<1x128xi1>
    %71 = vector.extract_strided_slice %16 {offsets = [0, 64], sizes = [8, 128], strides = [1, 1]} : vector<8x256xbf16> to vector<8x128xbf16>
    %cst_28 = arith.constant 0.000000e+00 : bf16
    %72 = vector.shape_cast %70 : vector<1x128xi1> to vector<1x128xi1>
    %73 = vector.broadcast %72 : vector<1x128xi1> to vector<8x128xi1>
    %74 = vector.broadcast %cst_28 : bf16 to vector<8x128xbf16>
    %75 = arith.select %73, %71, %74 : vector<8x128xi1>, vector<8x128xbf16>
    %c24 = arith.constant 24 : index
    %c0_29 = arith.constant 0 : index
    %76 = vector.load %arg10[%c24, %c0_29] : memref<60x128xbf16, #tpu.memory_space<vmem>>, vector<8x128xbf16>
    tpu.vector_store %arg10[%c24, %c0_29], %75 {strides = array<i32>} : memref<60x128xbf16, #tpu.memory_space<vmem>>, vector<8x128xbf16>,
    %c1_i32 = arith.constant 1 : i32
    %77 = vector.broadcast %c1_i32 : i32 to vector<1x128xi32>
    %78 = arith.addi %1, %77 : vector<1x128xi32>
    %c0_i32_30 = arith.constant 0 : i32
    %79 = vector.broadcast %c0_i32_30 : i32 to vector<1x128xi32>
    %80 = arith.cmpi sge, %78, %79 : vector<1x128xi32>
    %c1_i32_31 = arith.constant 1 : i32
    %81 = vector.broadcast %c1_i32_31 : i32 to vector<1x128xi32>
    %82 = arith.addi %1, %81 : vector<1x128xi32>
    %c16_i32_32 = arith.constant 16 : i32
    %83 = vector.broadcast %c16_i32_32 : i32 to vector<1x128xi32>
    %84 = arith.cmpi slt, %82, %83 : vector<1x128xi32>
    %85 = arith.andi %80, %84 : vector<1x128xi1>
    %86 = vector.extract_strided_slice %16 {offsets = [0, 65], sizes = [8, 128], strides = [1, 1]} : vector<8x256xbf16> to vector<8x128xbf16>
    %cst_33 = arith.constant 0.000000e+00 : bf16
    %87 = vector.shape_cast %85 : vector<1x128xi1> to vector<1x128xi1>
    %88 = vector.broadcast %87 : vector<1x128xi1> to vector<8x128xi1>
    %89 = vector.broadcast %cst_33 : bf16 to vector<8x128xbf16>
    %90 = arith.select %88, %86, %89 : vector<8x128xi1>, vector<8x128xbf16>
    %c32 = arith.constant 32 : index
    %c0_34 = arith.constant 0 : index
    %91 = vector.load %arg10[%c32, %c0_34] : memref<60x128xbf16, #tpu.memory_space<vmem>>, vector<8x128xbf16>
    tpu.vector_store %arg10[%c32, %c0_34], %90 {strides = array<i32>} : memref<60x128xbf16, #tpu.memory_space<vmem>>, vector<8x128xbf16>,
    %c2_i32 = arith.constant 2 : i32
    %92 = vector.broadcast %c2_i32 : i32 to vector<1x128xi32>
    %93 = arith.addi %1, %92 : vector<1x128xi32>
    %c0_i32_35 = arith.constant 0 : i32
    %94 = vector.broadcast %c0_i32_35 : i32 to vector<1x128xi32>
    %95 = arith.cmpi sge, %93, %94 : vector<1x128xi32>
    %c2_i32_36 = arith.constant 2 : i32
    %96 = vector.broadcast %c2_i32_36 : i32 to vector<1x128xi32>
    %97 = arith.addi %1, %96 : vector<1x128xi32>
    %c16_i32_37 = arith.constant 16 : i32
    %98 = vector.broadcast %c16_i32_37 : i32 to vector<1x128xi32>
    %99 = arith.cmpi slt, %97, %98 : vector<1x128xi32>
    %100 = arith.andi %95, %99 : vector<1x128xi1>
    %101 = vector.extract_strided_slice %16 {offsets = [0, 66], sizes = [8, 128], strides = [1, 1]} : vector<8x256xbf16> to vector<8x128xbf16>
    %cst_38 = arith.constant 0.000000e+00 : bf16
    %102 = vector.shape_cast %100 : vector<1x128xi1> to vector<1x128xi1>
    %103 = vector.broadcast %102 : vector<1x128xi1> to vector<8x128xi1>
    %104 = vector.broadcast %cst_38 : bf16 to vector<8x128xbf16>
    %105 = arith.select %103, %101, %104 : vector<8x128xi1>, vector<8x128xbf16>
    %c40 = arith.constant 40 : index
    %c0_39 = arith.constant 0 : index
    %106 = vector.load %arg10[%c40, %c0_39] : memref<60x128xbf16, #tpu.memory_space<vmem>>, vector<8x128xbf16>
    tpu.vector_store %arg10[%c40, %c0_39], %105 {strides = array<i32>} : memref<60x128xbf16, #tpu.memory_space<vmem>>, vector<8x128xbf16>,
    %c3_i32 = arith.constant 3 : i32
    %107 = vector.broadcast %c3_i32 : i32 to vector<1x128xi32>
    %108 = arith.addi %1, %107 : vector<1x128xi32>
    %c0_i32_40 = arith.constant 0 : i32
    %109 = vector.broadcast %c0_i32_40 : i32 to vector<1x128xi32>
    %110 = arith.cmpi sge, %108, %109 : vector<1x128xi32>
    %c3_i32_41 = arith.constant 3 : i32
    %111 = vector.broadcast %c3_i32_41 : i32 to vector<1x128xi32>
    %112 = arith.addi %1, %111 : vector<1x128xi32>
    %c16_i32_42 = arith.constant 16 : i32
    %113 = vector.broadcast %c16_i32_42 : i32 to vector<1x128xi32>
    %114 = arith.cmpi slt, %112, %113 : vector<1x128xi32>
    %115 = arith.andi %110, %114 : vector<1x128xi1>
    %116 = vector.extract_strided_slice %16 {offsets = [0, 67], sizes = [8, 128], strides = [1, 1]} : vector<8x256xbf16> to vector<8x128xbf16>
    %cst_43 = arith.constant 0.000000e+00 : bf16
    %117 = vector.shape_cast %115 : vector<1x128xi1> to vector<1x128xi1>
    %118 = vector.broadcast %117 : vector<1x128xi1> to vector<8x128xi1>
    %119 = vector.broadcast %cst_43 : bf16 to vector<8x128xbf16>
    %120 = arith.select %118, %116, %119 : vector<8x128xi1>, vector<8x128xbf16>
    %c48 = arith.constant 48 : index
    %c0_44 = arith.constant 0 : index
    %121 = vector.load %arg10[%c48, %c0_44] : memref<60x128xbf16, #tpu.memory_space<vmem>>, vector<8x128xbf16>
    tpu.vector_store %arg10[%c48, %c0_44], %120 {strides = array<i32>} : memref<60x128xbf16, #tpu.memory_space<vmem>>, vector<8x128xbf16>,
    %122 = vector.extract_strided_slice %9 {offsets = [0, 64], sizes = [4, 128], strides = [1, 1]} : vector<4x256xf32> to vector<4x128xf32>
    %c1_i32_45 = arith.constant 1 : i32
    %123 = vector.broadcast %c1_i32_45 : i32 to vector<1x128xi32>
    %124 = arith.cmpi sge, %1, %123 : vector<1x128xi32>
    %125 = vector.extract_strided_slice %9 {offsets = [0, 63], sizes = [4, 128], strides = [1, 1]} : vector<4x256xf32> to vector<4x128xf32>
    %cst_46 = arith.constant -1.000000e+30 : f32
    %126 = vector.shape_cast %124 : vector<1x128xi1> to vector<1x128xi1>
    %127 = vector.broadcast %126 : vector<1x128xi1> to vector<4x128xi1>
    %128 = vector.broadcast %cst_46 : f32 to vector<4x128xf32>
    %129 = arith.select %127, %125, %128 : vector<4x128xi1>, vector<4x128xf32>
    %c14_i32 = arith.constant 14 : i32
    %130 = vector.broadcast %c14_i32 : i32 to vector<1x128xi32>
    %131 = arith.cmpi sle, %1, %130 : vector<1x128xi32>
    %132 = vector.extract_strided_slice %9 {offsets = [0, 65], sizes = [4, 128], strides = [1, 1]} : vector<4x256xf32> to vector<4x128xf32>
    %cst_47 = arith.constant -1.000000e+30 : f32
    %133 = vector.shape_cast %131 : vector<1x128xi1> to vector<1x128xi1>
    %134 = vector.broadcast %133 : vector<1x128xi1> to vector<4x128xi1>
    %135 = vector.broadcast %cst_47 : f32 to vector<4x128xf32>
    %136 = arith.select %134, %132, %135 : vector<4x128xi1>, vector<4x128xf32>
    %137 = arith.maximumf %129, %122 : vector<4x128xf32>
    %138 = arith.maximumf %137, %136 : vector<4x128xf32>
    %139 = arith.truncf %138 : vector<4x128xf32> to vector<4x128xbf16>
    %c56 = arith.constant 56 : index
    %c0_48 = arith.constant 0 : index
    %140 = vector.load %arg10[%c56, %c0_48] : memref<60x128xbf16, #tpu.memory_space<vmem>>, vector<4x128xbf16>
    tpu.vector_store %arg10[%c56, %c0_48], %139 {strides = array<i32>} : memref<60x128xbf16, #tpu.memory_space<vmem>>, vector<4x128xbf16>,
    %c0_49 = arith.constant 0 : index
    %c0_50 = arith.constant 0 : index
    %141 = vector.load %arg6[%c0_49, %c0_50] : memref<32x60xbf16, #tpu.memory_space<vmem>>, vector<32x60xbf16>
    %c0_51 = arith.constant 0 : index
    %c0_52 = arith.constant 0 : index
    %142 = vector.load %arg10[%c0_51, %c0_52] : memref<60x128xbf16, #tpu.memory_space<vmem>>, vector<60x128xbf16>
    %cst_53 = arith.constant dense<0.000000e+00> : vector<32x128xf32>
    %143 = tpu.matmul %141, %142, %cst_53 {dimension_numbers = #tpu.dot_dimension_numbers<[1], [0], [0], [1], [0, 0, 1, 1], [], []>} : vector<32x60xbf16>, vector<60x128xbf16>, vector<32x128xf32> -> vector<32x128xf32>
    %c0_54 = arith.constant 0 : index
    %c0_55 = arith.constant 0 : index
    %144 = vector.load %arg7[%c0_54, %c0_55] : memref<32x1xf32, #tpu.memory_space<vmem>>, vector<32x1xf32>
    %145 = vector.broadcast %144 : vector<32x1xf32> to vector<32x128xf32>
    %146 = arith.addf %143, %145 : vector<32x128xf32>
    %147 = arith.truncf %146 : vector<32x128xf32> to vector<32x128xbf16>
    %c0_56 = arith.constant 0 : index
    %c0_57 = arith.constant 0 : index
    %148 = vector.load %arg8[%c0_56, %c0_57] : memref<32x128xbf16, #tpu.memory_space<vmem>>, vector<32x128xbf16>
    tpu.vector_store %arg8[%c0_56, %c0_57], %147 {strides = array<i32>} : memref<32x128xbf16, #tpu.memory_space<vmem>>, vector<32x128xbf16>,
    %149 = vector.broadcast %6 : vector<1x128xf32> to vector<32x128xf32>
    %150 = arith.mulf %143, %149 : vector<32x128xf32>
    %cst_58 = arith.constant dense<0.000000e+00> : vector<32xf32>
    %151 = vector.multi_reduction <add>, %150, %cst_58 [1] : vector<32x128xf32> to vector<32xf32>
    %152 = vector.shape_cast %151 : vector<32xf32> to vector<32x1xf32>
    %153 = arith.mulf %150, %150 : vector<32x128xf32>
    %cst_59 = arith.constant dense<0.000000e+00> : vector<32xf32>
    %154 = vector.multi_reduction <add>, %153, %cst_59 [1] : vector<32x128xf32> to vector<32xf32>
    %155 = vector.shape_cast %154 : vector<32xf32> to vector<32x1xf32>
    %156 = tpu.concatenate %152, %155 in 1 : vector<32x1xf32>, vector<32x1xf32> -> vector<32x2xf32>
    %157 = tpu.transpose %156, [1, 0] : vector<32x2xf32> -> vector<2x32xf32>
    %158 = vector.shape_cast %157 : vector<2x32xf32> to vector<1x2x32xf32>
    %c0_60 = arith.constant 0 : index
    %c0_61 = arith.constant 0 : index
    %c0_62 = arith.constant 0 : index
    %159 = vector.load %arg9[%c0_60, %c0_61, %c0_62] : memref<1x2x32xf32, #tpu.memory_space<vmem>>, vector<1x2x32xf32>
    tpu.vector_store %arg9[%c0_60, %c0_61, %c0_62], %158 {strides = array<i32>} : memref<1x2x32xf32, #tpu.memory_space<vmem>>, vector<1x2x32xf32>,
    return
  }
  func.func @transform_0(%arg0: i32) -> (i32, i32) {
    %c0_i32 = arith.constant 0 : i32
    %c0_i32_0 = arith.constant 0 : i32
    return %c0_i32, %arg0 : i32, i32
  }
  func.func @transform_1(%arg0: i32) -> (i32, i32) {
    %c0_i32 = arith.constant 0 : i32
    %c0_i32_0 = arith.constant 0 : i32
    return %c0_i32, %arg0 : i32, i32
  }
  func.func @transform_2(%arg0: i32) -> (i32, i32) {
    %c1_i32 = arith.constant 1 : i32
    %0 = arith.addi %arg0, %c1_i32 : i32
    %c1_i32_0 = arith.constant 1 : i32
    %1 = arith.muli %0, %c1_i32_0 : i32
    %c0_i32 = arith.constant 0 : i32
    %c0_i32_1 = arith.constant 0 : i32
    return %c0_i32, %1 : i32, i32
  }
  func.func @transform_3(%arg0: i32) -> (i32, i32) {
    %c0_i32 = arith.constant 0 : i32
    %c0_i32_0 = arith.constant 0 : i32
    %c0_i32_1 = arith.constant 0 : i32
    return %c0_i32, %c0_i32_0 : i32, i32
  }
  func.func @transform_4(%arg0: i32) -> (i32, i32) {
    %c0_i32 = arith.constant 0 : i32
    %c0_i32_0 = arith.constant 0 : i32
    %c0_i32_1 = arith.constant 0 : i32
    return %c0_i32, %c0_i32_0 : i32, i32
  }
  func.func @transform_5(%arg0: i32) -> (i32, i32) {
    %c0_i32 = arith.constant 0 : i32
    %c0_i32_0 = arith.constant 0 : i32
    %c0_i32_1 = arith.constant 0 : i32
    return %c0_i32, %c0_i32_0 : i32, i32
  }
  func.func @transform_6(%arg0: i32) -> (i32, i32) {
    %c0_i32 = arith.constant 0 : i32
    %c0_i32_0 = arith.constant 0 : i32
    %c0_i32_1 = arith.constant 0 : i32
    return %c0_i32, %c0_i32_0 : i32, i32
  }
  func.func @transform_7(%arg0: i32) -> (i32, i32) {
    %c0_i32 = arith.constant 0 : i32
    %c0_i32_0 = arith.constant 0 : i32
    return %c0_i32, %arg0 : i32, i32
  }
  func.func @transform_8(%arg0: i32) -> (i32, i32, i32) {
    %c0_i32 = arith.constant 0 : i32
    %c0_i32_0 = arith.constant 0 : i32
    %c0_i32_1 = arith.constant 0 : i32
    return %arg0, %c0_i32, %c0_i32_0 : i32, i32, i32
  }
}

</mosaic_0001>

<bundles_post_ra>
// kernel: tpu_custom_call.1
= control target key start
LH: loop header
LB: loop body
LE: loop exit
PB: predicated region body
PF: predicated region fallthrough
CT: control target
= control target key end

     0   :  { %14 = vsyncpa [#allocation4], 0  ;;  %vm69_vm0 = vcmask 1041408   ;;  %v124_v2 = vlaneseq  ;;  %v788_v5 = vmov 0   ;;  %vm65_vm1 = vcmask 31744   ;;  %s790_s11 = smov 61   ;;  %s1028_s0 = inlined_call_operand.vmem [shape: s32[2,128], index: 0, kind: input, shape index: {}]   ;;  %s1029_s1 = inlined_call_operand.vmem [shape: f32[4,256], index: 1, kind: input, shape index: {}]   ;;  %s1030_s2 = inlined_call_operand.vmem [shape: f32[4,256], index: 2, kind: input, shape index: {}]   ;;  %s1031_s3 = inlined_call_operand.vmem [shape: bf16[8,4], index: 3, kind: input, shape index: {}]   ;;  %s1032_s4 = inlined_call_operand.vmem [shape: f32[8,1], index: 4, kind: input, shape index: {}]   ;;  %s1033_s5 = inlined_call_operand.vmem [shape: bf16[32,60], index: 5, kind: input, shape index: {}]   ;;  %s1034_s6 = inlined_call_operand.vmem [shape: f32[32,1], index: 6, kind: input, shape index: {}]   ;;  %s1035_s7 = inlined_call_operand.hbm [shape: bf16[32,128], index: 7, kind: output, shape index: {0}]   ;;  %s1036_s8 = inlined_call_operand.hbm [shape: f32[1,2,32], index: 8, kind: output, shape index: {1}]  }
   0x1   :  { %v848_v0 = vld [vmem:[%s1030_s2 + $0x4] sm:$0xf]  ;;  %v853_v1 = vld [vmem:[%s1029_s1] sm:$0xf]  ;;  %108 = vmatprep.mubr.bf16.mxu0 %v788_v5  ;;  %717 = vset.pattern.permute.xlu0 %v788_v5 }
   0x2   :  { %v58_v3 = vpack.c.bf16 %v848_v0, %v848_v0  ;;  %v57_v4 = vpack.c.bf16 %v853_v1, %v853_v1  ;;  %v59_v6 = vld [vmem:[%s1032_s4] sm:$0xff]  ;;  %v869_v8 = vshrl.u32 %v124_v2, 7  ;;  %733 = vset.pattern.permute.xlu1 %v788_v5 }
   0x3   :  { %v867_v7 = vld [vmem:[%s1028_s0] sm:$0x3]  ;;  %62 = vperm.xlu0 %717, %v59_v6  }
   0x4   :  { %v152_v9 = vadd.s32 4294967294, %v867_v7  ;;  %v185_v10 = vadd.s32 4294967295, %v867_v7  ;;  %v119_v11 = vadd.s32 4294967293, %v867_v7  ;;  %650 = vmatprep.subr.msk.bf16.mxu0 %vm69_vm0, %v58_v3  ;;  %v71_v12 = vsel %vm69_vm0, %v57_v4, 0  ;;  %v56_v14 = vld [vmem:[%s1031_s3] sm:$0xf] }
   0x5   :  { %v250_v13 = vadd.s32 1, %v867_v7  ;;  %vm218_vm2 = vcmp.ge.s32.totalorder %v867_v7, 0  ;;  %vm219_vm3 = vcmp.lt.s32.totalorder %v867_v7, 16  ;;  %77 = vmatpush1.bf16.msra.mxu0 %v71_v12  ;;  %v884_v15 = vsub.s32 0, %v869_v8  ;;  %s789_s3 = smov 62  }
   0x6   :  { %vm153_vm4 = vcmp.ge.s32.totalorder %v152_v9, 0  ;;  %vm154_vm5 = vcmp.lt.s32.totalorder %v152_v9, 16  ;;  %vm186_vm6 = vcmp.ge.s32.totalorder %v185_v10, 0  ;;  %vm220_vm7 = vmand %vm218_vm2, %vm219_vm3  ;;  %vm187_vm9 = vcmp.lt.s32.totalorder %v185_v10, 16 }
   0x7   :  { %vm155_vm8 = vmand %vm153_vm4, %vm154_vm5  ;;  %vm120_vm10 = vcmp.ge.s32.totalorder %v119_v11, 0  ;;  %vm121_vm11 = vcmp.lt.s32.totalorder %v119_v11, 16  ;;  %vm251_vm12 = vcmp.ge.s32.totalorder %v250_v13, 0  ;;  %vm252_vm14 = vcmp.lt.s32.totalorder %v250_v13, 16 }
   0x8   :  { %v156_v16 = vsel %vm155_vm8, 1, %v788_v5  ;;  %vm188_vm13 = vmand %vm186_vm6, %vm187_vm9  ;;  %v221_v17 = vsel %vm220_vm7, 1, %v788_v5  ;;  %v316_v18 = vadd.s32 3, %v867_v7  ;;  %651 = vmatmul.mubr.msk.bf16.vlgmr.msra.gmra.mrb[0].mxu0 %vm65_vm1, %v56_v14  ;;  %v283_v26 = vadd.s32 2, %v867_v7 }
   0x9   :  { %v160_v19 = vrot.slane %v156_v16, %v884_v15  ;;  %v189_v20 = vsel %vm188_vm13, 1, %v788_v5  ;;  %vm122_vm15 = vmand %vm120_vm10, %vm121_vm11  ;;  %v225_v21 = vrot.slane %v221_v17, %v884_v15 }
   0xa   :  { %v193_v22 = vrot.slane %v189_v20, %v884_v15  ;;  %v123_v23 = vsel %vm122_vm15, 1, %v788_v5  ;;  %vm253_vm0 = vmand %vm251_vm12, %vm252_vm14  ;;  %vm317_vm2 = vcmp.ge.s32.totalorder %v316_v18, 0  ;;  %vm318_vm3 = vcmp.lt.s32.totalorder %v316_v18, 16 }
   0xb   :  { %vm161_vm4 = vcmp.eq.s32.totalorder %v160_v19, 1  ;;  %v127_v24 = vrot.slane %v123_v23, %v884_v15  ;;  %v254_v25 = vsel %vm253_vm0, 1, %v788_v5  ;;  %vm319_vm1 = vmand %vm317_vm2, %vm318_vm3  ;;  %vm901_vm9 = vcmp.eq.s32.totalorder %v225_v21, 1 }
   0xc   :  { %vm162_vm5 = vmpackc.low %vm161_vm4, %vm161_vm4  ;;  %vm194_vm6 = vcmp.eq.s32.totalorder %v193_v22, 1  ;;  %v258_v27 = vrot.slane %v254_v25, %v884_v15  ;;  %v320_v28 = vsel %vm319_vm1, 1, %v788_v5  ;;  %vm284_vm14 = vcmp.ge.s32.totalorder %v283_v26, 0 }
   0xd   :  { %v163_v29 = vsel %vm162_vm5, 65537, %v788_v5  ;;  %vm195_vm7 = vmpackc.low %vm194_vm6, %vm194_vm6  ;;  %vm128_vm8 = vcmp.eq.s32.totalorder %v127_v24, 1  ;;  %v324_v31 = vrot.slane %v320_v28, %v884_v15  ;;  %vm285_vm15 = vcmp.lt.s32.totalorder %v283_v26, 16 }
   0xe   :  { %v167_v32 = vrot.slane %v163_v29, %v884_v15  ;;  %v196_v33 = vsel %vm195_vm7, 65537, %v788_v5  ;;  %vm129_vm10 = vmpackc.low %vm128_vm8, %vm128_vm8  ;;  %vm259_vm11 = vcmp.eq.s32.totalorder %v258_v27, 1 }
   0xf   :  { %v130_v34 = vsel %vm129_vm10, 65537, %v788_v5  ;;  %vm260_vm12 = vmpackc.low %vm259_vm11, %vm259_vm11  ;;  %vm909_vm13 = vcmp.eq.s32.totalorder %v324_v31, 1  ;;  %v200_v36 = vrot.slane %v196_v33, %v884_v15 }
  0x10   :  { %168 = vrot.lane.b32.xlu1 %v167_v32, %s789_s3  ;;  %v134_v37 = vrot.slane %v130_v34, %v884_v15  ;;  %vm227_vm0 = vmpackc.low %vm901_vm9, %vm901_vm9  ;;  %v261_v38 = vsel %vm260_vm12, 65537, %v788_v5 }
  0x11   :  { %v228_v39 = vsel %vm227_vm0, 65537, %v788_v5  ;;  %vm326_vm2 = vmpackc.low %vm909_vm13, %vm909_vm13 }
  0x12   :  { %135 = vrot.lane.b32.xlu0 %v134_v37, %s790_s11  ;;  %v232_v40 = vrot.slane %v228_v39, %v884_v15  ;;  %vm286_vm3 = vmand %vm284_vm14, %vm285_vm15 }
  0x13   :  { %v287_v41 = vsel %vm286_vm3, 1, %v788_v5 }
  0x14   :  { %15 = vsyncpa [#allocation6], 0  ;;  %s791_s12 = smov 63   ;;  %v265_v42 = vrot.slane %v261_v38, %v884_v15  ;;  %v291_v43 = vrot.slane %v287_v41, %v884_v15  ;;  %v327_v44 = vsel %vm326_vm2, 65537, %v788_v5  ;;  %s792_s13 = smov 64   ;;  %v723_v48 = vpack.i.bf16 %v848_v0, %v853_v1  ;;  %v738_v26 = vld [vmem:[%s1033_s5] sm:$0xff]  }
  0x15   :  { %201 = vrot.lane.b32.xlu1 %v200_v36, %s791_s12  ;;  %s793_s14 = smov 65   ;;  %v331_v45 = vrot.slane %v327_v44, %v884_v15  ;;  %s794_s15 = smov 66   ;;  %vm437_vm12 = vcmask 490496   ;;  %vm349_vm13 = vcmp.ge.s32.totalorder %v867_v7, 1  ;;  %vm181_vm14 = vcmask 539648  }
  0x16   :  { %233 = vrot.lane.b32.xlu0 %v232_v40, %s792_s13  ;;  %vm292_vm4 = vcmp.eq.s32.totalorder %v291_v43, 1  ;;  %s795_s16 = smov 67   ;;  %700 = vmatprep.mubr.msk.bf16.mxu1 %vm437_vm12, %v738_v26  ;;  %vm148_vm15 = vcmask 547840   ;;  %v350_v33 = vsel %vm349_vm13, 1, %v788_v5  ;;  %vm366_vm0 = vcmp.le.s32.totalorder %v867_v7, 14 }
  0x17   :  { %vm293_vm1 = vmpackc.low %vm292_vm4, %vm292_vm4  ;;  %v354_v37 = vrot.slane %v350_v33, %v884_v15  ;;  %vm246_vm2 = vcmask 523264   ;;  %vm214_vm3 = vcmask 531456   ;;  %v367_v43 = vsel %vm366_vm0, 1, %v788_v5 }
  0x18   :  { %v294_v46 = vsel %vm293_vm1, 65537, %v788_v5  ;;  %vm279_vm1 = vcmask 515072   ;;  %v371_v5 = vrot.slane %v367_v43, %v884_v15 }
  0x19   :  { %266 = vrot.lane.b32.xlu1 %v265_v42, %s793_s14  ;;  %v298_v47 = vrot.slane %v294_v46, %v884_v15  ;;  %vm970_vm4 = vcmp.eq.s32.totalorder %v354_v37, 1 }
  0x1b   :  { %299 = vrot.lane.b32.xlu0 %v298_v47, %s794_s15 }
  0x1d   :  { %332 = vrot.lane.b32.xlu1 %v331_v45, %s795_s16 }
  0x1f   :  { %719 = vrot.lane.b32.xlu0 %v723_v48, %s793_s14 }
  0x21   :  { %724 = vrot.lane.b32.xlu1 %v723_v48, %s792_s13 }
  0x82   :  { %v63_v49 = vpop.permute.xlu0 %62  ;;  %v169_v50 = vpop.permute.xlu1 %168 }
  0x83   :  { %vm170_vm5 = vcmp.ne.s16.totalorder %v169_v50, 0 }
  0x86   :  { %v136_v52 = vpop.permute.xlu0 %135 }
  0x87   :  { %v202_v51 = vpop.permute.xlu1 %201  ;;  %vm137_vm6 = vcmp.ne.s16.totalorder %v136_v52, 0 }
  0x88   :  { %vm203_vm9 = vcmp.ne.s16.totalorder %v202_v51, 0 }
  0x8a   :  { %v234_v54 = vpop.permute.xlu0 %233 }
  0x8b   :  { %v267_v53 = vpop.permute.xlu1 %266  ;;  %vm235_vm11 = vcmp.ne.s16.totalorder %v234_v54, 0 }
  0x8c   :  { %vm268_vm10 = vcmp.ne.s16.totalorder %v267_v53, 0 }
  0x8e   :  { %v300_v56 = vpop.permute.xlu0 %299 }
  0x8f   :  { %v333_v55 = vpop.permute.xlu1 %332  ;;  %vm301_vm8 = vcmp.ne.s16.totalorder %v300_v56, 0 }
  0x90   :  { %vm334_vm7 = vcmp.ne.s16.totalorder %v333_v55, 0 }
  0x92   :  { %v720_v28 = vpop.permute.xlu0 %719 }
  0x93   :  { %v725_v27 = vpop.permute.xlu1 %724  ;;  %v722_v39 = vunpack.i.h.bf16 %v720_v28  ;;  %v721_v40 = vunpack.i.l.bf16 %v720_v28  ;;  %v497_v28 = vld [vmem:[%s1034_s6] sm:$0xff] }
  0x94   :  { %v727_v44 = vunpack.i.h.bf16 %v725_v27  ;;  %v726_v47 = vunpack.i.l.bf16 %v725_v27 }
  0x95   :  { %v363_v51 = vsel %vm214_vm3, %v721_v40, %v722_v39 }
  0xdb   :  { %v110_v57 = vpop.f32.mrb[0].mxu0 }
  0xdc   :  { %v111_v58 = vadd.f32 %v110_v57, %v63_v49  ;;  %v112_v59 = vpop.f32.mrb[1].mxu0  ;;  %v386_v57 = vsel %vm246_vm2, %v726_v47, %v727_v44 }
  0xdd   :  { %v113_v60 = vadd.f32 %v112_v59, %v63_v49  ;;  %v114_v61 = vpop.f32.mrb[2].mxu0 }
  0xde   :  { %v117_v62 = vpack.c.bf16 %v111_v58, %v111_v58  ;;  %v115_v63 = vpop.f32.mrb[3].mxu0  ;;  %v365_v58 = vsel %vm970_vm4, %v363_v51, -1e+30 }
  0xdf   :  { %v118_v0 = vpack.c.bf16 %v113_v60, %v113_v60  ;;  %v388_v15 = vmax.f32 %v365_v58, %v386_v57 }
  0xe0   :  { %v335_v1 = vsel %vm334_vm7, %v117_v62, 0  ;;  %v302_v2 = vsel %vm301_vm8, %v117_v62, 0  ;;  %v171_v3 = vsel %vm170_vm5, %v117_v62, 0  ;;  %v138_v4 = vsel %vm137_vm6, %v117_v62, 0 }
  0xe1   :  { %v336_v6 = vsel %vm334_vm7, %v118_v0, 0  ;;  %v303_v9 = vsel %vm301_vm8, %v118_v0, 0  ;;  %v172_v10 = vsel %vm170_vm5, %v118_v0, 0  ;;  %v139_v11 = vsel %vm137_vm6, %v118_v0, 0 }
  0xe2   :  { %v658_v12 = vcombine.low %v335_v1, %v336_v6  ;;  %v657_v13 = vcombine.low %v302_v2, %v303_v9  ;;  %v653_v14 = vcombine.low %v171_v3, %v172_v10  ;;  %v652_v16 = vcombine.low %v138_v4, %v139_v11 }
  0xe3   :  { %v204_v17 = vsel %vm203_vm9, %v117_v62, 0  ;;  %v205_v18 = vsel %vm203_vm9, %v118_v0, 0  ;;  %v236_v19 = vsel %vm235_vm11, %v117_v62, 0  ;;  %v237_v20 = vsel %vm235_vm11, %v118_v0, 0 }
  0xe4   :  { %178 = vrot.lane.b32.xlu1 %v653_v14, %s794_s15  ;;  %145 = vrot.lane.b32.xlu0 %v652_v16, %s795_s16  ;;  %v654_v21 = vcombine.low %v204_v17, %v205_v18  ;;  %v655_v22 = vcombine.low %v236_v19, %v237_v20  ;;  %v269_v23 = vsel %vm268_vm10, %v117_v62, 0  ;;  %v270_v24 = vsel %vm268_vm10, %v118_v0, 0 }
  0xe5   :  { %v656_v25 = vcombine.low %v269_v23, %v270_v24  ;;  %vm312_vm5 = vcmask 506880   ;;  %vm345_vm6 = vcmask 498688   ;;  %vm372_vm7 = vcmp.eq.s32.totalorder %v371_v5, 1 }
  0xe6   :  { %vm444_vm8 = vcmask 1045504   ;;  %vm51_vm9 = vcmp.gt.s32.totalorder %v867_v7, 0  ;;  %v796_v14 = vmov 0.0   ;;  %vm573_vm10 = vcmask 7168  }
  0xe7   :  { %v648_v16 = vsel %vm51_vm9, 1.0, %v796_v14 }
  0xe8   :  { %211 = vrot.lane.b32.xlu0 %v654_v21, %s793_s14  ;;  %243 = vrot.lane.b32.xlu1 %v655_v22, %s792_s13 }
  0xec   :  { %276 = vrot.lane.b32.xlu1 %v656_v25, %s791_s12  ;;  %309 = vrot.lane.b32.xlu0 %v657_v13, %s789_s3  ;;  %v547_v13 = vsub.s32 1, %v869_v8 }
  0xee   :  { %v548_v17 = vrot.slane %v648_v16, %v547_v13 }
  0xf0   :  { %342 = vrot.lane.b32.xlu1 %v658_v12, %s790_s11  ;;  %729 = vrot.lane.b32.xlu0 %v723_v48, %s791_s12  ;;  %v739_v12 = vld [vmem:[%s1033_s5 + $0x8] sm:$0xff]  }
 0x156   :  { %v179_v29 = vpop.permute.xlu1 %178  ;;  %v146_v30 = vpop.permute.xlu0 %145 }
 0x157   :  { %v180_v31 = vrot.slane %v179_v29, 4  ;;  %v147_v32 = vrot.slane %v146_v30, 4 }
 0x159   :  { %v182_v34 = vsel %vm181_vm14, %v179_v29, %v180_v31  ;;  %v149_v35 = vsel %vm148_vm15, %v146_v30, %v147_v32  ;;  %v499_v29 = vld [vmem:[%s1034_s6 + $0x10] sm:$0xff]  ;;  %v500_v30 = vld [vmem:[%s1034_s6 + $0x18] sm:$0xff]  ;;  %v498_v31 = vld [vmem:[%s1034_s6 + $0x8] sm:$0xff]  ;;  %s797_s6 = smov [#allocation3]  }
 0x15a   :  { %184 = vst [vmem:[#allocation2 + $0x4] sm:$0xf] %v182_v34  ;;  %151 = vst [vmem:[#allocation2] sm:$0xf] %v149_v35  ;;  %v244_v36 = vpop.permute.xlu1 %243  ;;  %v212_v38 = vpop.permute.xlu0 %211  ;;  %s617_s28 = sshll.u32 %s797_s6, 4  ;;  %s618_s28 = int_to_ptr.vmem [resolvable:$true] %s617_s28 }
 0x15b   :  { %v245_v41 = vrot.slane %v244_v36, 4  ;;  %v213_v42 = vrot.slane %v212_v38, 4  ;;  %s740_s29 = scalar_lea.vmem %s618_s28, 256  ;;  %p745_p1 = scmp.lt.s32.totalorder %s618_s28, %s618_s28 }
 0x15c   :  { %p741_p0 = scmp.ne.s32.totalorder %s618_s28, %s740_s29  ;;  %p746_p2 = scmp.lt.s32.totalorder %s740_s29, %s740_s29 }
 0x15d   :  { %v247_v45 = vsel %vm246_vm2, %v244_v36, %v245_v41  ;;  %v215_v46 = vsel %vm214_vm3, %v212_v38, %v213_v42 }
 0x15e   :  { %249 = vst [vmem:[#allocation2 + $0xc] sm:$0xf] %v247_v45  ;;  %217 = vst [vmem:[#allocation2 + $0x8] sm:$0xf] %v215_v46  ;;  %v277_v49 = vpop.permute.xlu1 %276  ;;  %v310_v50 = vpop.permute.xlu0 %309  ;;  %p747_p3 = por %p746_p2, %p745_p1 }
 0x15f   :  { %v278_v52 = vrot.slane %v277_v49, 4  ;;  %v311_v53 = vrot.slane %v310_v50, 4 }
 0x160   :  { %p748_p4 = pnand %p747_p3, %p741_p0 }
 0x161   :  { %v280_v54 = vsel %vm279_vm1, %v277_v49, %v278_v52  ;;  %v313_v55 = vsel %vm312_vm5, %v310_v50, %v311_v53  ;;  %v734_v56 = vld [vmem:[#allocation2] sm:$0xff]  }
 0x162   :  { %282 = vst [vmem:[#allocation2 + $0x10] sm:$0xf] %v280_v54  ;;  %315 = vst [vmem:[#allocation2 + $0x14] sm:$0xf] %v313_v55  ;;  %v343_v59 = vpop.permute.xlu1 %342  ;;  %v730_v60 = vpop.permute.xlu0 %729  ;;  %692 = vmatprep.subr.bf16.mxu1 %v734_v56 }
 0x163   :  { %v344_v61 = vrot.slane %v343_v59, 4  ;;  %v732_v62 = vunpack.i.h.bf16 %v730_v60  ;;  %v731_v63 = vunpack.i.l.bf16 %v730_v60  ;;  %693 = vmatpush3.bf16.msra.mxu1 %v734_v56 }
 0x165   :  { %v346_v0 = vsel %vm345_vm6, %v343_v59, %v344_v61  ;;  %v378_v1 = vsel %vm279_vm1, %v731_v63, %v732_v62  ;;  %v735_v2 = vld [vmem:[#allocation2 + $0x8] sm:$0xff]  }
 0x166   :  { %348 = vst [vmem:[#allocation2 + $0x18] sm:$0xf] %v346_v0  ;;  %v380_v3 = vsel %vm372_vm7, %v378_v1, -1e+30  ;;  %694 = vmatprep.subr.bf16.mxu1 %v735_v2 }
 0x167   :  { %v389_v4 = vmax.f32 %v388_v15, %v380_v3  ;;  %695 = vmatpush3.bf16.msra.mxu1 %v735_v2 }
 0x169   :  { %v390_v6 = vpack.c.bf16 %v389_v4, %v389_v4  ;;  %v736_v9 = vld [vmem:[#allocation2 + $0x10] sm:$0xff]  }
 0x16a   :  { %696 = vmatprep.subr.bf16.mxu1 %v736_v9 }
 0x16b   :  { %391 = vst [vmem:[#allocation2 + $0x1c] sm:$0x3] %v390_v6  ;;  %697 = vmatpush3.bf16.msra.mxu1 %v736_v9 }
 0x172   :  { %v737_v10 = vld [vmem:[#allocation2 + $0x18] sm:$0x3f]  }
 0x173   :  { %704 = vmatprep.subr.msk.bf16.mxu1 %vm444_vm8, %v737_v10  ;;  %v446_v11 = vsel %vm444_vm8, %v737_v10, 0 }
 0x174   :  { %699 = vmatpush3.bf16.msra.mxu1 %v446_v11 }
 0x177   :  { %701 = vmatmul.mubr.msk.bf16.vlgmr.msra.gmra.mrb[0].mxu1 %vm437_vm12, %v739_v12 }
 0x24a   :  { %v702_v18 = vpop.f32.mrb[0].mxu1 }
 0x24b   :  { %v482_v19 = vpop.f32.mrb[1].mxu1  ;;  %v551_v20 = vmul.f32 %v702_v18, %v548_v17 }
 0x24c   :  { %v703_v21 = vpop.f32.mrb[2].mxu1  ;;  %v549_v22 = vmul.f32 %v548_v17, %v482_v19 }
 0x24d   :  { %v485_v23 = vpop.f32.mrb[3].mxu1  ;;  %557 = vadd.xlane.f32.xlu1 %v551_v20  ;;  %v563_v25 = vmul.f32 %v551_v20, %v551_v20  ;;  %v552_v26 = vmul.f32 %v703_v21, %v548_v17 }
 0x24e   :  { %553 = vadd.xlane.f32.xlu0 %v549_v22  ;;  %v561_v24 = vmul.f32 %v549_v22, %v549_v22  ;;  %v550_v27 = vmul.f32 %v548_v17, %v485_v23 }
 0x24f   :  { %v564_v8 = vmul.f32 %v552_v26, %v552_v26 }
 0x250   :  { %v562_v7 = vmul.f32 %v550_v27, %v550_v27 }
 0x251   :  { %565 = vadd.xlane.f32.xlu1 %v561_v24 }
 0x252   :  { %569 = vadd.xlane.f32.xlu0 %v563_v25 }
 0x255   :  { %559 = vadd.xlane.f32.xlu1 %v552_v26 }
 0x256   :  { %555 = vadd.xlane.f32.xlu0 %v550_v27 }
 0x25a   :  { %567 = vadd.xlane.f32.xlu0 %v562_v7 }
 0x25e   :  { %571 = vadd.xlane.f32.xlu0 %v564_v8 }
 0x266   :  { %503 = vperm.xlu1 %733, %v497_v28  }
 0x26a   :  { %513 = vperm.xlu1 %733, %v499_v29  }
 0x26e   :  { %518 = vperm.xlu1 %733, %v500_v30  }
 0x274   :  { %508 = vperm.xlu0 %717, %v498_v31  }
 0x2da   :  { %v558_v32 = vpop.xlane.xlu1 %557 }
 0x2db   :  { %v554_v33 = vpop.xlane.xlu0 %553 }
 0x2de   :  { %v566_v34 = vpop.xlane.xlu1 %565 }
 0x2df   :  { %v570_v35 = vpop.xlane.xlu0 %569  ;;  %v574_v36 = vsel %vm573_vm10, %v554_v33, %v566_v34 }
 0x2e0   :  { %578 = vxpose.xlu0.b32.start [1/4] (short) (narrow) %v574_v36, 8  ;;  %v576_v43 = vsel %vm573_vm10, %v558_v32, %v570_v35 }
 0x2e2   :  { %v560_v37 = vpop.xlane.xlu1 %559 }
 0x2e3   :  { %v556_v38 = vpop.xlane.xlu0 %555 }
 0x2e6   :  { %v504_v39 = vpop.permute.xlu1 %503 }
 0x2e7   :  { %v568_v40 = vpop.xlane.xlu0 %567  ;;  %v521_v51 = vadd.f32 %v504_v39, %v482_v19 }
 0x2e8   :  { %v575_v41 = vsel %vm573_vm10, %v556_v38, %v568_v40 }
 0x2e9   :  { %579 = vxpose.xlu0.b32.cont [2/4] (short) (narrow) %v575_v41, 8 }
 0x2ea   :  { %v514_v42 = vpop.permute.xlu1 %513 }
 0x2eb   :  { %v572_v44 = vpop.xlane.xlu0 %571  ;;  %v523_v46 = vadd.f32 %v702_v18, %v514_v42 }
 0x2ec   :  { %v577_v48 = vsel %vm573_vm10, %v560_v37, %v572_v44 }
 0x2ed   :  { %580 = vxpose.xlu0.b32.cont [3/4] (short) (narrow) %v576_v43, 8 }
 0x2ee   :  { %v519_v45 = vpop.permute.xlu1 %518 }
 0x2ef   :  { %v524_v47 = vadd.f32 %v703_v21, %v519_v45 }
 0x2f1   :  { %v683_v49 = vpack.c.bf16 %v524_v47, %v523_v46  ;;  %581 = vxpose.xlu0.b32.end [4/4] (short) (narrow) %v577_v48, 8 }
 0x2f3   :  { %685 = vst [vmem:[#allocation3 + $0x8] sm:$0xff] %v683_v49   ;;  %v509_v50 = vpop.permute.xlu0 %508 }
 0x2f4   :  { %v522_v52 = vadd.f32 %v509_v50, %v485_v23 }
 0x2f6   :  { %v678_v53 = vpack.c.bf16 %v522_v52, %v521_v51 }
 0x2f8   :  { %679 = vst [vmem:[#allocation3] sm:$0xff] %v678_v53  }
 0x2f9   :  { %751 = shalt.err (!%p748_p4)
}
 0x2fa   :  { %s752_s9 = scalar_lea.hbm %s1035_s7, 256 }
 0x2fb   :  { %p753_p5 = scmp.ne.s32.totalorder %s1035_s7, %s752_s9  ;;  %p756_p6 = scmp.lt.u32.totalorder %s752_s9, %s1035_s7 }
 0x2fd   :  { %p758_p7 = pnand %p756_p6, %p753_p5 }
 0x2ff   :  { %761 = shalt.err (!%p758_p7)
}
 0x300   :  { %s798_s3 = smov 4   ;;  %s799_s14 = smov [#allocation5]   ;;  %vm610_vm11 = vcmask 254976  }
 0x301   :  { %623 = dma.vmem_to_hbm [thread:$0]  %s618_s28, 256, %s1035_s7, [#allocation4], %s792_s13, %s792_s13, %s798_s3  }
 0x302   :  { %s630_s15 = sshll.u32 %s799_s14, 4  ;;  %s631_s15 = int_to_ptr.vmem [resolvable:$true] %s630_s15 }
 0x303   :  { %s762_s16 = scalar_lea.vmem %s631_s15, 32  ;;  %p767_p9 = scmp.lt.s32.totalorder %s631_s15, %s631_s15 }
 0x304   :  { %p763_p8 = scmp.ne.s32.totalorder %s631_s15, %s762_s16  ;;  %p768_p10 = scmp.lt.s32.totalorder %s762_s16, %s762_s16 }
 0x306   :  { %p769_p11 = por %p768_p10, %p767_p9 }
 0x308   :  { %p770_p12 = pnand %p769_p11, %p763_p8 }
 0x365   :  { %v594_v5 = vpop.trf.xlu0 }
 0x366   :  { %611 = vst.msk [vmem:[#allocation5] sm:$0x3] %vm610_vm11, %v594_v5 }
 0x367   :  { %773 = shalt.err (!%p770_p12)
}
 0x368   :  { %s774_s19 = scalar_lea.hbm %s1036_s8, 32 }
 0x369   :  { %p775_p13 = scmp.ne.s32.totalorder %s1036_s8, %s774_s19  ;;  %p778_p0 = scmp.lt.u32.totalorder %s774_s19, %s1036_s8 }
 0x36b   :  { %p780_p1 = pnand %p778_p0, %p775_p13 }
 0x36d   :  { %783 = shalt.err (!%p780_p1)
}
 0x36e   :  { %633 = dma.vmem_to_hbm [thread:$0]  %s631_s15, 32, %s1036_s8, [#allocation6]  }
 0x36f   :  { %784 = dma.done.wait [#allocation4], 256  }
 0x370   :  { %785 = vsyncadd [#allocation4], 4294967040 }
 0x371   :  { %786 = dma.done.wait [#allocation6], 32  }
 0x372   :  { %787 = vsyncadd [#allocation6], 4294967264 }
 0x373   :  { %640 = vsyncpa [#allocation4], 1 }
 0x374   :  { %641 = vsyncpa [#allocation6], 1 }

</bundles_post_ra>
